<compile_context>
chip_gen: v5e
topology: v5e:2x2
jax: 0.10.0
libtpu: 0.0.40
codegen_flags: <defaults>
</compile_context>

<pallas_src>
import functools

import jax
import jax.numpy as jnp
from jax import lax
from jax.experimental import pallas as pl
from jax.experimental.pallas import tpu as pltpu


# --------------------------------------------------------------------------
# Generation-aware VMEM budgeting.
# --------------------------------------------------------------------------
_VMEM_CAP = None


def _vmem_capacity_bytes():
    global _VMEM_CAP
    if _VMEM_CAP is None:
        cap = None
        try:
            info = pltpu.get_tpu_info()
            cap = getattr(info, "vmem_capacity_bytes", None)
        except Exception:
            cap = None
        _VMEM_CAP = int(cap) if cap else 64 * 1024 * 1024  # conservative (v7x)
    return _VMEM_CAP


def _vmem_limit_bytes():
    # Raise the scoped limit above the 16/32 MiB defaults, but leave headroom.
    return min(_vmem_capacity_bytes() * 3 // 4, 100 * 1024 * 1024)


def _round_up(x, m):
    return ((x + m - 1) // m) * m


# --------------------------------------------------------------------------
# Generic tiled matmul + bias:  (M, K) @ (K, N) + (1, N) -> (M, N)
# Used for (a) hoisted LSTM input projection and (b) final FC to vocab.
# Inputs x/w are expected in bf16 (cast in the wrapper), bias in f32.
# --------------------------------------------------------------------------
def _matmul_bias_kernel(x_ref, w_ref, b_ref, o_ref):
    acc = jnp.dot(x_ref[...], w_ref[...], preferred_element_type=jnp.float32)
    o_ref[...] = (acc + b_ref[...]).astype(o_ref.dtype)


def matmul_bias(x, w, b, *, out_dtype=jnp.float32, tm_pref=256, tn_pref=None):
    """x: (M, K) bf16; w: (K, N) bf16; b: (1, N) f32."""
    M, K = x.shape
    Kw, N = w.shape
    assert K == Kw
    cap = _vmem_capacity_bytes()
    if tn_pref is None:
        # Larger lane-dense tiles when VMEM is plentiful (v5e/v6e 128 MiB).
        tn_pref = 1024 if cap >= (96 << 20) else 512
    vmem_limit = _vmem_limit_bytes()
    budget = int(vmem_limit * 0.8)

    Mp0 = _round_up(max(M, 8), 8)
    Np0 = _round_up(max(N, 128), 128)
    tm = min(tm_pref, Mp0)
    tn = min(tn_pref, Np0)

    def est(tm_, tn_):
        # Double-buffered working set (x, w, bias blocks + out block).
        return 2 * (tm_ * K * x.dtype.itemsize
                    + K * tn_ * w.dtype.itemsize
                    + tm_ * tn_ * jnp.dtype(out_dtype).itemsize
                    + tn_ * 4)

    while est(tm, tn) > budget:
        if tm > 8 and (tm >= tn or tn <= 128):
            tm = max(8, _round_up(tm // 2, 8))
        elif tn > 128:
            tn = max(128, _round_up(tn // 2, 128))
        else:
            break

    Mp = _round_up(Mp0, tm)
    Np = _round_up(Np0, tn)

    xp = x if Mp == M else jnp.pad(x, ((0, Mp - M), (0, 0)))
    wp = w if Np == N else jnp.pad(w, ((0, 0), (0, Np - N)))
    bp = b if Np == N else jnp.pad(b, ((0, 0), (0, Np - N)))

    out = pl.pallas_call(
        _matmul_bias_kernel,
        out_shape=jax.ShapeDtypeStruct((Mp, Np), out_dtype),
        grid_spec=pltpu.PrefetchScalarGridSpec(
            num_scalar_prefetch=0,
            grid=(Mp // tm, Np // tn),
            in_specs=[
                pl.BlockSpec((tm, K), lambda i, j: (i, 0)),
                pl.BlockSpec((K, tn), lambda i, j: (0, j)),
                pl.BlockSpec((1, tn), lambda i, j: (0, j)),
            ],
            out_specs=pl.BlockSpec((tm, tn), lambda i, j: (i, j)),
        ),
        compiler_params=pltpu.CompilerParams(
            dimension_semantics=("parallel", "parallel"),
            vmem_limit_bytes=vmem_limit),
    )(xp, wp, bp)
    if Mp != M or Np != N:
        out = out[:M, :N]
    return out


# --------------------------------------------------------------------------
# LSTM recurrence over time.  The input projection is precomputed; per step
# only  gates = G_in[t] + h @ W_hh^T  remains.  Gate order: i, f, g, o, each
# occupying a lane-aligned Hp-wide block.
# --------------------------------------------------------------------------
def _lstm_recurrent_kernel(gin_ref, whh_ref, h0_ref, c0_ref,
                           out_ref, hT_ref, cT_ref,
                           h_scr, c_scr, *, hidden_padded, chunk, unroll):
    Hp = hidden_padded

    @pl.when(pl.program_id(0) == 0)
    def _():
        h_scr[...] = h0_ref[...]
        c_scr[...] = c0_ref[...]

    whh = whh_ref[...]                      # (Hp, 4Hp) bf16, resident per chunk
    h = h_scr[...]                          # (Bp, Hp) f32
    c = c_scr[...]                          # (Bp, Hp) f32

    def step(t, carry):
        h, c = carry
        gates = gin_ref[t].astype(jnp.float32) + jnp.dot(
            h.astype(whh.dtype), whh, preferred_element_type=jnp.float32)
        i_g = jax.nn.sigmoid(gates[:, 0 * Hp:1 * Hp])
        f_g = jax.nn.sigmoid(gates[:, 1 * Hp:2 * Hp])
        g_g = jnp.tanh(gates[:, 2 * Hp:3 * Hp])
        o_g = jax.nn.sigmoid(gates[:, 3 * Hp:4 * Hp])
        c = f_g * c + i_g * g_g
        h = o_g * jnp.tanh(c)
        out_ref[t] = h.astype(out_ref.dtype)
        return h, c

    h, c = lax.fori_loop(0, chunk, step, (h, c), unroll=unroll)

    h_scr[...] = h
    c_scr[...] = c
    # Resident output blocks: written every chunk, final value survives.
    hT_ref[...] = h
    cT_ref[...] = c


def _pick_chunk(T, Bp, Hp, max_chunk=64):
    """Largest divisor of T whose double-buffered chunk working set fits the
    per-generation VMEM budget."""
    budget = int(_vmem_limit_bytes() * 0.6)
    fixed = 2 * (Hp * 4 * Hp * 2)            # W_hh^T bf16 (double-buffered)
    fixed += 8 * (Bp * Hp * 4)               # h0/c0/hT/cT blocks + h/c scratch
    per_step = 2 * (Bp * 4 * Hp * 2)         # G_in chunk rows, bf16, 2 buffers
    per_step += 2 * (Bp * Hp * 2)            # out chunk rows, bf16, 2 buffers
    avail = max(budget - fixed, per_step)
    cmax = int(max(1, min(avail // per_step, max_chunk)))
    c = min(T, cmax)
    while c > 1 and T % c != 0:
        c -= 1
    return max(c, 1)


def lstm_layer(x, w_ih, w_hh, b_ih, b_hh, h0, c0, *, time_chunk=None):
    """x: (T, B, E); w_ih: (4H, E); w_hh: (4H, H); biases: (4H,); h0/c0: (B, H).
    Returns (out (T,B,H) bf16, hT (B,H) f32, cT (B,H) f32)."""
    T, B, E = x.shape
    H = h0.shape[-1]
    Hp = _round_up(H, 128)     # lane-dense gate slices / state stores
    Bp = _round_up(B, 8)       # sublane-aligned batch

    # Pad the gate structure to Hp per gate.  Padded gate lanes get zero
    # weights + zero bias -> gates_pad = 0 -> i*g = 0, c_pad stays 0, h_pad
    # stays 0, so real outputs are unchanged.
    def pad_gates_out(wm):                     # (4H, X) -> (4Hp, X)
        X = wm.shape[1]
        return jnp.pad(wm.reshape(4, H, X),
                       ((0, 0), (0, Hp - H), (0, 0))).reshape(4 * Hp, X)

    wih_p = pad_gates_out(w_ih)                                  # (4Hp, E)
    whh_p = jnp.pad(pad_gates_out(w_hh), ((0, 0), (0, Hp - H)))  # (4Hp, Hp)
    bias_p = jnp.pad((b_ih + b_hh).reshape(4, H),
                     ((0, 0), (0, Hp - H))).reshape(1, 4 * Hp).astype(jnp.float32)

    wih_t = wih_p.T.astype(jnp.bfloat16)                         # (E, 4Hp)
    whh_t = whh_p.T.astype(jnp.bfloat16)                         # (Hp, 4Hp)

    # Batch padding before the hoisted projection (so M = T*Bp is 8-aligned).
    xp = x if Bp == B else jnp.pad(x, ((0, 0), (0, Bp - B), (0, 0)))

    # ---- Hoisted input projection (no recurrent dependency): one big matmul,
    # emitted in bf16 (dominant HBM stream feeding the serial recurrence).
    g_in = matmul_bias(xp.reshape(T * Bp, E).astype(jnp.bfloat16), wih_t,
                       bias_p, out_dtype=jnp.bfloat16)
    g_in = g_in.reshape(T, Bp, 4 * Hp)

    # ---- Sequential recurrence, chunked over time (VMEM-budgeted chunk).
    chunk = time_chunk if time_chunk is not None else _pick_chunk(T, Bp, Hp)
    assert T % chunk == 0, "time_chunk must divide T"
    unroll = True if chunk <= 8 else 8

    h0p = jnp.pad(h0.astype(jnp.float32), ((0, Bp - B), (0, Hp - H)))
    c0p = jnp.pad(c0.astype(jnp.float32), ((0, Bp - B), (0, Hp - H)))

    kernel = functools.partial(_lstm_recurrent_kernel,
                               hidden_padded=Hp, chunk=chunk, unroll=unroll)

    out, hT, cT = pl.pallas_call(
        kernel,
        out_shape=(
            jax.ShapeDtypeStruct((T, Bp, Hp), jnp.bfloat16),
            jax.ShapeDtypeStruct((Bp, Hp), jnp.float32),
            jax.ShapeDtypeStruct((Bp, Hp), jnp.float32),
        ),
        grid_spec=pltpu.PrefetchScalarGridSpec(
            num_scalar_prefetch=0,
            grid=(T // chunk,),
            in_specs=[
                pl.BlockSpec((chunk, Bp, 4 * Hp), lambda ci: (ci, 0, 0)),  # G_in
                pl.BlockSpec((Hp, 4 * Hp), lambda ci: (0, 0)),             # W_hh^T
                pl.BlockSpec((Bp, Hp), lambda ci: (0, 0)),                 # h0
                pl.BlockSpec((Bp, Hp), lambda ci: (0, 0)),                 # c0
            ],
            out_specs=[
                pl.BlockSpec((chunk, Bp, Hp), lambda ci: (ci, 0, 0)),      # per-step h
                pl.BlockSpec((Bp, Hp), lambda ci: (0, 0)),                 # final h
                pl.BlockSpec((Bp, Hp), lambda ci: (0, 0)),                 # final c
            ],
            scratch_shapes=[
                pltpu.VMEM((Bp, Hp), jnp.float32),                         # h state
                pltpu.VMEM((Bp, Hp), jnp.float32),                         # c state
            ],
        ),
        compiler_params=pltpu.CompilerParams(
            dimension_semantics=("arbitrary",),    # recurrence -> sequential
            vmem_limit_bytes=_vmem_limit_bytes()),
    )(g_in, whh_t, h0p, c0p)

    return out[:, :B, :H], hT[:B, :H], cT[:B, :H]


# --------------------------------------------------------------------------
# Full model forward (mirrors LSTM.forward in eval mode).
# --------------------------------------------------------------------------
def lstm_model_forward(params, token_ids, hidden):
    """token_ids: (T, B) int32; hidden: tuple of (num_layers, B, H) each."""
    h0_all, c0_all = hidden
    num_layers = h0_all.shape[0]

    # Embedding lookup (gather glue).  self.drop is identity in eval mode.
    emb = jnp.take(params["embedding"], token_ids, axis=0)   # (T, B, E)

    x = emb
    h_finals, c_finals = [], []
    for layer in range(num_layers):
        lp = params["lstm"][layer]
        x, hT, cT = lstm_layer(x, lp["w_ih"], lp["w_hh"], lp["b_ih"], lp["b_hh"],
                               h0_all[layer], c0_all[layer])
        h_finals.append(hT)
        c_finals.append(cT)
        # inter-layer dropout is identity in eval mode

    T, B, H = x.shape
    V = params["fc_w"].shape[0]
    fc_w_t = params["fc_w"].T.astype(jnp.bfloat16)            # (H, V)
    fc_b = params["fc_b"].reshape(1, V).astype(jnp.float32)
    logits2d = matmul_bias(x.reshape(T * B, H).astype(jnp.bfloat16), fc_w_t, fc_b,
                           out_dtype=jnp.float32)
    logits = logits2d.reshape(T, B, V)
    return logits, (jnp.stack(h_finals, axis=0), jnp.stack(c_finals, axis=0))


# --------------------------------------------------------------------------
# Deterministic parameter init (matches module shapes / init_weights ranges).
# --------------------------------------------------------------------------
def init_params(key, vocab_size, embedding_size, hidden_size, num_layers):
    keys = jax.random.split(key, 2 + 4 * num_layers)
    initrange = 0.1
    params = {
        "embedding": jax.random.uniform(keys[0], (vocab_size, embedding_size),
                                        jnp.float32, -initrange, initrange),
        "fc_w": jax.random.uniform(keys[1], (vocab_size, hidden_size),
                                   jnp.float32, -initrange, initrange),
        "fc_b": jnp.zeros((vocab_size,), jnp.float32),
        "lstm": [],
    }
    stdv = 1.0 / (hidden_size ** 0.5)   # PyTorch nn.LSTM default init range
    for layer in range(num_layers):
        in_sz = embedding_size if layer == 0 else hidden_size
        k = keys[2 + 4 * layer: 2 + 4 * (layer + 1)]
        params["lstm"].append({
            "w_ih": jax.random.uniform(k[0], (4 * hidden_size, in_sz),
                                       jnp.float32, -stdv, stdv),
            "w_hh": jax.random.uniform(k[1], (4 * hidden_size, hidden_size),
                                       jnp.float32, -stdv, stdv),
            "b_ih": jax.random.uniform(k[2], (4 * hidden_size,),
                                       jnp.float32, -stdv, stdv),
            "b_hh": jax.random.uniform(k[3], (4 * hidden_size,),
                                       jnp.float32, -stdv, stdv),
        })
    return params


if __name__ == "__main__":
    # Small config consistent with the module's constructor.
    vocab_size = 64
    batch_size = 2
    embedding_size = 32
    hidden_size = 32
    num_layers = 2
    num_step = 8   # sequence length

    key = jax.random.PRNGKey(0)
    pkey, ikey = jax.random.split(key)
    params = init_params(pkey, vocab_size, embedding_size, hidden_size, num_layers)

    token_ids = jax.random.randint(ikey, (num_step, batch_size), 0, vocab_size,
                                   dtype=jnp.int32)
    hidden = (jnp.zeros((num_layers, batch_size, hidden_size), jnp.float32),
              jnp.zeros((num_layers, batch_size, hidden_size), jnp.float32))

    logits, (hT, cT) = lstm_model_forward(params, token_ids, hidden)
    jax.block_until_ready((logits, hT, cT))

    assert logits.shape == (num_step, batch_size, vocab_size)
    assert hT.shape == (num_layers, batch_size, hidden_size)
    assert cT.shape == (num_layers, batch_size, hidden_size)
    assert bool(jnp.all(jnp.isfinite(logits)))
    assert bool(jnp.all(jnp.isfinite(hT))) and bool(jnp.all(jnp.isfinite(cT)))
    print("KERNEL_OK")
</pallas_src>

<mosaic_0001>
module attributes {stable_mosaic.version = 11 : i64} {
  func.func @_matmul_bias_kernel(%arg0: i32, %arg1: i32, %arg2: memref<64x32xbf16, #tpu.memory_space<vmem>>, %arg3: memref<32x512xbf16, #tpu.memory_space<vmem>>, %arg4: memref<1x512xf32, #tpu.memory_space<vmem>>, %arg5: memref<64x512xbf16, #tpu.memory_space<vmem>>) attributes {dimension_semantics = [#tpu.dimension_semantics<parallel>, #tpu.dimension_semantics<parallel>], iteration_bounds = array<i64: 1, 1>, scalar_prefetch = 0 : i64, scratch_operands = 0 : i64, tpu.core_type = #tpu.core_type<tc>, window_params = [{transform_indices = @transform_0, window_bounds = array<i64: 64, 32>}, {transform_indices = @transform_1, window_bounds = array<i64: 32, 512>}, {transform_indices = @transform_2, window_bounds = array<i64: 1, 512>}, {transform_indices = @transform_3, window_bounds = array<i64: 64, 512>}]} {
    %c0 = arith.constant 0 : index
    %c0_0 = arith.constant 0 : index
    %0 = vector.load %arg2[%c0, %c0_0] : memref<64x32xbf16, #tpu.memory_space<vmem>>, vector<64x32xbf16>
    %c0_1 = arith.constant 0 : index
    %c0_2 = arith.constant 0 : index
    %1 = vector.load %arg3[%c0_1, %c0_2] : memref<32x512xbf16, #tpu.memory_space<vmem>>, vector<32x512xbf16>
    %cst = arith.constant dense<0.000000e+00> : vector<64x512xf32>
    %2 = tpu.matmul %0, %1, %cst {dimension_numbers = #tpu.dot_dimension_numbers<[1], [0], [0], [1], [0, 0, 1, 1], [], []>} : vector<64x32xbf16>, vector<32x512xbf16>, vector<64x512xf32> -> vector<64x512xf32>
    %c0_3 = arith.constant 0 : index
    %c0_4 = arith.constant 0 : index
    %3 = vector.load %arg4[%c0_3, %c0_4] : memref<1x512xf32, #tpu.memory_space<vmem>>, vector<1x512xf32>
    %4 = vector.broadcast %3 : vector<1x512xf32> to vector<64x512xf32>
    %5 = arith.addf %2, %4 : vector<64x512xf32>
    %6 = arith.truncf %5 : vector<64x512xf32> to vector<64x512xbf16>
    %c0_5 = arith.constant 0 : index
    %c0_6 = arith.constant 0 : index
    %7 = vector.load %arg5[%c0_5, %c0_6] : memref<64x512xbf16, #tpu.memory_space<vmem>>, vector<64x512xbf16>
    tpu.vector_store %arg5[%c0_5, %c0_6], %6 {strides = array<i32>} : memref<64x512xbf16, #tpu.memory_space<vmem>>, vector<64x512xbf16>,
    return
  }
  func.func @transform_0(%arg0: i32, %arg1: i32) -> (i32, i32) {
    %c0_i32 = arith.constant 0 : i32
    %c0_i32_0 = arith.constant 0 : i32
    return %arg0, %c0_i32 : i32, i32
  }
  func.func @transform_1(%arg0: i32, %arg1: i32) -> (i32, i32) {
    %c0_i32 = arith.constant 0 : i32
    %c0_i32_0 = arith.constant 0 : i32
    return %c0_i32, %arg1 : i32, i32
  }
  func.func @transform_2(%arg0: i32, %arg1: i32) -> (i32, i32) {
    %c0_i32 = arith.constant 0 : i32
    %c0_i32_0 = arith.constant 0 : i32
    return %c0_i32, %arg1 : i32, i32
  }
  func.func @transform_3(%arg0: i32, %arg1: i32) -> (i32, i32) {
    %c0_i32 = arith.constant 0 : i32
    return %arg0, %arg1 : i32, i32
  }
}

</mosaic_0001>

<bundles_post_ra>
// kernel: tpu_custom_call.1
= control target key start
LH: loop header
LB: loop body
LE: loop exit
PB: predicated region body
PF: predicated region fallthrough
CT: control target
= control target key end

     0   :  { %8 = vsyncpa [#allocation3], 0  ;;  %s537_s0 = inlined_call_operand.vmem [shape: bf16[64,32], index: 0, kind: input, shape index: {}]   ;;  %s538_s1 = inlined_call_operand.hbm [shape: bf16[32,512], index: 1, kind: input, shape index: {}]   ;;  %s539_s2 = inlined_call_operand.vmem [shape: f32[1,512], index: 2, kind: input, shape index: {}]   ;;  %s540_s3 = inlined_call_operand.hbm [shape: bf16[64,512], index: 3, kind: output, shape index: {}]  }
   0x1   :  { %9 = vsyncpa [#allocation4], 0  ;;  %s16_s14 = sshll.u32 %s538_s1, 4  ;;  %s430_s15 = smov [#allocation2]   ;;  %s17_s14 = int_to_ptr.hbm [resolvable:$true] %s16_s14 }
   0x2   :  { %s18_s16 = sshll.u32 %s430_s15, 4  ;;  %s431_s17 = smov 256   ;;  %s19_s16 = int_to_ptr.vmem [resolvable:$true] %s18_s16 }
   0x3   :  { %s432_s18 = smov 16  }
   0x4   :  { %24 = dma.hbm_to_vmem [thread:$0]  %s17_s14, 1024, %s19_s16, [#allocation3], %s431_s17, %s431_s17, %s432_s18  }
   0x5   :  { %426 = dma.done.wait [#allocation3], 1024  }
   0x6   :  { %427 = vsyncadd [#allocation3], 4294966272  ;;  %v332_v0 = vld [vmem:[#allocation2 + $0x20] sm:$0xf]  ;;  %v372_v1 = vld [vmem:[#allocation2 + $0x2c] sm:$0xf0] }
   0x7   :  { %v370_v2 = vld [vmem:[#allocation2 + $0x24] sm:$0xf]  ;;  %v333_v3 = vor.u32 %v372_v1, %v332_v0  ;;  %v334_v4 = vld [vmem:[#allocation2 + $0x30] sm:$0xf0]  ;;  %v340_v5 = vld [vmem:[#allocation2 + $0x28] sm:$0xf] }
   0x8   :  { %v373_v6 = vld [vmem:[#allocation2 + $0x34] sm:$0xf0]  ;;  %v337_v7 = vor.u32 %v370_v2, %v334_v4  ;;  %v371_v9 = vld [vmem:[#allocation2 + $0x2c] sm:$0xf]  ;;  %v342_v10 = vld [vmem:[#allocation2 + $0x38] sm:$0xf0] }
   0x9   :  { %v341_v8 = vor.u32 %v373_v6, %v340_v5  ;;  %v316_v11 = vld [vmem:[#allocation2] sm:$0xf]  ;;  %137 = vmatpush.bf16.msra.mxu0 %v333_v3  ;;  %v345_v12 = vor.u32 %v371_v9, %v342_v10  ;;  %v368_v13 = vld [vmem:[#allocation2 + $0xc] sm:$0xf0]  ;;  %v366_v14 = vld [vmem:[#allocation2 + $0x4] sm:$0xf] }
   0xa   :  { %v318_v15 = vld [vmem:[#allocation2 + $0x10] sm:$0xf0]  ;;  %166 = vmatpush.bf16.msra.mxu1 %v337_v7  ;;  %v317_v16 = vor.u32 %v368_v13, %v316_v11  ;;  %v324_v18 = vld [vmem:[#allocation2 + $0x8] sm:$0xf]  ;;  %v369_v19 = vld [vmem:[#allocation2 + $0x14] sm:$0xf0] }
   0xb   :  { %195 = vmatpush.bf16.msra.mxu2 %v341_v8  ;;  %v321_v17 = vor.u32 %v366_v14, %v318_v15  ;;  %v367_v20 = vld [vmem:[#allocation2 + $0xc] sm:$0xf]  ;;  %224 = vmatpush.bf16.msra.mxu3 %v345_v12  ;;  %v325_v21 = vor.u32 %v369_v19, %v324_v18  ;;  %v326_v22 = vld [vmem:[#allocation2 + $0x18] sm:$0xf0]  ;;  %v362_v24 = vld [vmem:[%s537_s0] sm:$0xff]  ;;  %vm118_vm0 = vcmask 261120  }
   0xc   :  { %v329_v23 = vor.u32 %v367_v20, %v326_v22  ;;  %v363_v25 = vld [vmem:[%s537_s0 + $0x8] sm:$0xff]  ;;  %v364_v26 = vld [vmem:[%s537_s0 + $0x10] sm:$0xff]  ;;  %v365_v27 = vld [vmem:[%s537_s0 + $0x18] sm:$0xff]  ;;  %s433_s0 = smov [#allocation5]   ;;  %s285_s30 = sshll.u32 %s540_s3, 4  ;;  %s286_s30 = int_to_ptr.hbm [resolvable:$true] %s285_s30 }
   0xd   :  { %138 = vmatpush.bf16.msra.mxu0 %v317_v16  ;;  %v48_v28 = vld [vmem:[%s539_s2] sm:$0xf]  ;;  %s283_s2 = sshll.u32 %s433_s0, 4  ;;  %s284_s2 = int_to_ptr.vmem [resolvable:$true] %s283_s2 }
   0xe   :  { %167 = vmatpush.bf16.msra.mxu1 %v321_v17  ;;  %v491_v29 = vperm.slane %v48_v28, 0  ;;  %v493_v30 = vperm.slane %v48_v28, 1  ;;  %v497_v36 = vperm.slane %v48_v28, 2  ;;  %v499_v37 = vperm.slane %v48_v28, 3 }
   0xf   :  { %196 = vmatpush.bf16.msra.mxu2 %v325_v21  ;;  %225 = vmatpush.bf16.msra.mxu3 %v329_v23 }
  0x10   :  { %346 = vmatmul.msk.bf16.vlgmr.msra.gmra.mxu0 %vm118_vm0, %v362_v24 }
  0x11   :  { %350 = vmatmul.msk.bf16.vlgmr.msra.gmra.mxu1 %vm118_vm0, %v362_v24 }
  0x12   :  { %354 = vmatmul.msk.bf16.vlgmr.msra.gmra.mxu2 %vm118_vm0, %v362_v24  ;;  %358 = vmatmul.msk.bf16.vlgmr.msra.gmra.mxu3 %vm118_vm0, %v362_v24 }
  0x20   :  { %347 = vmatmul.msk.bf16.gmra.mxu0 %vm118_vm0, %v363_v25 }
  0x21   :  { %351 = vmatmul.msk.bf16.gmra.mxu1 %vm118_vm0, %v363_v25 }
  0x22   :  { %355 = vmatmul.msk.bf16.gmra.mxu2 %vm118_vm0, %v363_v25  ;;  %359 = vmatmul.msk.bf16.gmra.mxu3 %vm118_vm0, %v363_v25 }
  0x30   :  { %348 = vmatmul.msk.bf16.gmra.mxu0 %vm118_vm0, %v364_v26 }
  0x31   :  { %352 = vmatmul.msk.bf16.gmra.mxu1 %vm118_vm0, %v364_v26 }
  0x32   :  { %356 = vmatmul.msk.bf16.gmra.mxu2 %vm118_vm0, %v364_v26  ;;  %360 = vmatmul.msk.bf16.gmra.mxu3 %vm118_vm0, %v364_v26 }
  0x40   :  { %349 = vmatmul.msk.bf16.gmra.mxu0 %vm118_vm0, %v365_v27 }
  0x41   :  { %353 = vmatmul.msk.bf16.gmra.mxu1 %vm118_vm0, %v365_v27 }
  0x42   :  { %357 = vmatmul.msk.bf16.gmra.mxu2 %vm118_vm0, %v365_v27  ;;  %361 = vmatmul.msk.bf16.gmra.mxu3 %vm118_vm0, %v365_v27 }
  0x8d   :  { %v140_v31 = vpop.f32.mrf.mxu0 }
  0x8e   :  { %v141_v32 = vadd.f32 %v140_v31, %v491_v29  ;;  %v169_v33 = vpop.f32.mrf.mxu1 }
  0x8f   :  { %v170_v34 = vadd.f32 %v169_v33, %v493_v30 }
  0x91   :  { %v247_v35 = vpack.c.bf16 %v170_v34, %v141_v32 }
  0x93   :  { %263 = vst [vmem:[#allocation5] sm:$0xff] %v247_v35 }
  0x95   :  { %v198_v38 = vpop.f32.mrf.mxu2  ;;  %v227_v40 = vpop.f32.mrf.mxu3 }
  0x96   :  { %v199_v39 = vadd.f32 %v198_v38, %v497_v36  ;;  %v142_v41 = vpop.f32.mrf.mxu0  ;;  %v228_v42 = vadd.f32 %v227_v40, %v499_v37  ;;  %v171_v44 = vpop.f32.mrf.mxu1 }
  0x97   :  { %v143_v43 = vadd.f32 %v142_v41, %v491_v29  ;;  %v172_v45 = vadd.f32 %v171_v44, %v493_v30 }
  0x98   :  { %v248_v46 = vpack.c.bf16 %v228_v42, %v199_v39 }
  0x99   :  { %v249_v47 = vpack.c.bf16 %v172_v45, %v143_v43 }
  0x9a   :  { %264 = vst [vmem:[#allocation5 + $0x8] sm:$0xff] %v248_v46 }
  0x9b   :  { %265 = vst [vmem:[#allocation5 + $0x10] sm:$0xff] %v249_v47 }
  0x9d   :  { %v200_v48 = vpop.f32.mrf.mxu2  ;;  %v229_v50 = vpop.f32.mrf.mxu3 }
  0x9e   :  { %v201_v49 = vadd.f32 %v200_v48, %v497_v36  ;;  %v145_v51 = vpop.f32.mrf.mxu0  ;;  %v230_v52 = vadd.f32 %v229_v50, %v499_v37  ;;  %v174_v54 = vpop.f32.mrf.mxu1 }
  0x9f   :  { %v146_v53 = vadd.f32 %v145_v51, %v491_v29  ;;  %v175_v55 = vadd.f32 %v174_v54, %v493_v30 }
  0xa0   :  { %v250_v56 = vpack.c.bf16 %v230_v52, %v201_v49 }
  0xa1   :  { %v251_v57 = vpack.c.bf16 %v175_v55, %v146_v53 }
  0xa2   :  { %266 = vst [vmem:[#allocation5 + $0x18] sm:$0xff] %v250_v56 }
  0xa3   :  { %267 = vst [vmem:[#allocation5 + $0x20] sm:$0xff] %v251_v57 }
  0xa5   :  { %v203_v58 = vpop.f32.mrf.mxu2  ;;  %v232_v60 = vpop.f32.mrf.mxu3 }
  0xa6   :  { %v204_v59 = vadd.f32 %v203_v58, %v497_v36  ;;  %v147_v61 = vpop.f32.mrf.mxu0  ;;  %v233_v62 = vadd.f32 %v232_v60, %v499_v37  ;;  %v176_v0 = vpop.f32.mrf.mxu1 }
  0xa7   :  { %v148_v63 = vadd.f32 %v147_v61, %v491_v29  ;;  %v177_v1 = vadd.f32 %v176_v0, %v493_v30 }
  0xa8   :  { %v252_v2 = vpack.c.bf16 %v233_v62, %v204_v59 }
  0xa9   :  { %v253_v3 = vpack.c.bf16 %v177_v1, %v148_v63 }
  0xaa   :  { %268 = vst [vmem:[#allocation5 + $0x28] sm:$0xff] %v252_v2 }
  0xab   :  { %269 = vst [vmem:[#allocation5 + $0x30] sm:$0xff] %v253_v3 }
  0xad   :  { %v205_v4 = vpop.f32.mrf.mxu2  ;;  %v234_v6 = vpop.f32.mrf.mxu3 }
  0xae   :  { %v206_v5 = vadd.f32 %v205_v4, %v497_v36  ;;  %v150_v7 = vpop.f32.mrf.mxu0  ;;  %v235_v8 = vadd.f32 %v234_v6, %v499_v37  ;;  %v179_v10 = vpop.f32.mrf.mxu1 }
  0xaf   :  { %v151_v9 = vadd.f32 %v150_v7, %v491_v29  ;;  %v180_v11 = vadd.f32 %v179_v10, %v493_v30 }
  0xb0   :  { %v254_v12 = vpack.c.bf16 %v235_v8, %v206_v5 }
  0xb1   :  { %v255_v13 = vpack.c.bf16 %v180_v11, %v151_v9 }
  0xb2   :  { %270 = vst [vmem:[#allocation5 + $0x38] sm:$0xff] %v254_v12 }
  0xb3   :  { %271 = vst [vmem:[#allocation5 + $0x40] sm:$0xff] %v255_v13 }
  0xb5   :  { %v208_v14 = vpop.f32.mrf.mxu2  ;;  %v237_v16 = vpop.f32.mrf.mxu3 }
  0xb6   :  { %v209_v15 = vadd.f32 %v208_v14, %v497_v36  ;;  %v152_v17 = vpop.f32.mrf.mxu0  ;;  %v238_v18 = vadd.f32 %v237_v16, %v499_v37  ;;  %v181_v20 = vpop.f32.mrf.mxu1 }
  0xb7   :  { %v153_v19 = vadd.f32 %v152_v17, %v491_v29  ;;  %v182_v21 = vadd.f32 %v181_v20, %v493_v30 }
  0xb8   :  { %v256_v22 = vpack.c.bf16 %v238_v18, %v209_v15 }
  0xb9   :  { %v257_v23 = vpack.c.bf16 %v182_v21, %v153_v19 }
  0xba   :  { %272 = vst [vmem:[#allocation5 + $0x48] sm:$0xff] %v256_v22 }
  0xbb   :  { %273 = vst [vmem:[#allocation5 + $0x50] sm:$0xff] %v257_v23 }
  0xbd   :  { %v210_v24 = vpop.f32.mrf.mxu2  ;;  %v239_v26 = vpop.f32.mrf.mxu3 }
  0xbe   :  { %v211_v25 = vadd.f32 %v210_v24, %v497_v36  ;;  %v155_v27 = vpop.f32.mrf.mxu0  ;;  %v240_v28 = vadd.f32 %v239_v26, %v499_v37  ;;  %v184_v32 = vpop.f32.mrf.mxu1 }
  0xbf   :  { %v156_v31 = vadd.f32 %v155_v27, %v491_v29  ;;  %v185_v33 = vadd.f32 %v184_v32, %v493_v30 }
  0xc0   :  { %v258_v34 = vpack.c.bf16 %v240_v28, %v211_v25 }
  0xc1   :  { %v259_v35 = vpack.c.bf16 %v185_v33, %v156_v31 }
  0xc2   :  { %274 = vst [vmem:[#allocation5 + $0x58] sm:$0xff] %v258_v34 }
  0xc3   :  { %275 = vst [vmem:[#allocation5 + $0x60] sm:$0xff] %v259_v35 }
  0xc5   :  { %v213_v38 = vpop.f32.mrf.mxu2  ;;  %v242_v40 = vpop.f32.mrf.mxu3 }
  0xc6   :  { %v214_v39 = vadd.f32 %v213_v38, %v497_v36  ;;  %v157_v41 = vpop.f32.mrf.mxu0  ;;  %v243_v42 = vadd.f32 %v242_v40, %v499_v37  ;;  %v186_v44 = vpop.f32.mrf.mxu1 }
  0xc7   :  { %v158_v43 = vadd.f32 %v157_v41, %v491_v29  ;;  %v187_v45 = vadd.f32 %v186_v44, %v493_v30 }
  0xc8   :  { %v260_v46 = vpack.c.bf16 %v243_v42, %v214_v39 }
  0xc9   :  { %v261_v47 = vpack.c.bf16 %v187_v45, %v158_v43 }
  0xca   :  { %276 = vst [vmem:[#allocation5 + $0x68] sm:$0xff] %v260_v46 }
  0xcb   :  { %277 = vst [vmem:[#allocation5 + $0x70] sm:$0xff] %v261_v47 }
  0xcd   :  { %v215_v48 = vpop.f32.mrf.mxu2  ;;  %v244_v50 = vpop.f32.mrf.mxu3 }
  0xce   :  { %v216_v49 = vadd.f32 %v215_v48, %v497_v36  ;;  %v245_v51 = vadd.f32 %v244_v50, %v499_v37 }
  0xd0   :  { %v262_v29 = vpack.c.bf16 %v245_v51, %v216_v49 }
  0xd2   :  { %278 = vst [vmem:[#allocation5 + $0x78] sm:$0xff] %v262_v29 }
  0xd3   :  { %291 = dma.vmem_to_hbm [thread:$0]  %s284_s2, 2048, %s286_s30, [#allocation4], %s431_s17, %s431_s17, %s432_s18  }
  0xd4   :  { %428 = dma.done.wait [#allocation4], 2048  }
  0xd5   :  { %429 = vsyncadd [#allocation4], 4294965248 }
  0xd6   :  { %296 = vsyncpa [#allocation3], 1 }
  0xd7   :  { %297 = vsyncpa [#allocation4], 1 }

</bundles_post_ra>
